<compile_context>
chip_gen: v6e
topology: v6e:2x2x1
jax: 0.10.0
libtpu: 0.0.40
codegen_flags: <defaults>
</compile_context>

<pallas_src>
import functools
import numpy as np

import jax
import jax.numpy as jnp
from jax.experimental import pallas as pl
from jax.experimental.pallas import tpu as pltpu


# -----------------------------------------------------------------------------
# Helpers
# -----------------------------------------------------------------------------
def _vmem_spec():
    return pl.BlockSpec(memory_space=pltpu.MemorySpace.VMEM)


def _pick_tile(dim, cap, align):
    """Largest tile <= cap that is a multiple of `align` and divides `dim`;
    if dim already fits under cap (or no aligned divisor exists) use the full
    dim (full-extent blocks are always legal)."""
    if dim <= cap:
        return dim
    t = (cap // align) * align
    while t >= align:
        if dim % t == 0:
            return t
        t -= align
    return dim


# -----------------------------------------------------------------------------
# Tiled linear (+ optional activation), bf16 MXU operands, f32 accumulation.
# -----------------------------------------------------------------------------
def _linear_kernel(x_ref, w_ref, b_ref, o_ref, acc_ref, *, activation):
    @pl.when(pl.program_id(2) == 0)
    def _():
        acc_ref[...] = jnp.zeros_like(acc_ref)

    acc_ref[...] += jnp.dot(x_ref[...].astype(jnp.bfloat16),
                            w_ref[...].astype(jnp.bfloat16),
                            preferred_element_type=jnp.float32)

    @pl.when(pl.program_id(2) == pl.num_programs(2) - 1)
    def _():
        y = acc_ref[...] + b_ref[...]
        if activation == "tanh":
            y = jnp.tanh(y)
        elif activation == "sigmoid":
            y = jax.nn.sigmoid(y)
        o_ref[...] = y.astype(o_ref.dtype)


def linear(x, w, b, activation="none", out_dtype=jnp.float32,
           tm_cap=256, tn_cap=256, tk_cap=512):
    n, k = x.shape
    k2, m = w.shape
    assert k == k2
    tm = _pick_tile(n, tm_cap, 8)
    tn = _pick_tile(m, tn_cap, 128)
    tk = _pick_tile(k, tk_cap, 128)
    grid = (n // tm, m // tn, k // tk)
    return pl.pallas_call(
        functools.partial(_linear_kernel, activation=activation),
        out_shape=jax.ShapeDtypeStruct((n, m), out_dtype),
        grid=grid,
        in_specs=[
            pl.BlockSpec((tm, tk), lambda i, j, kk: (i, kk)),
            pl.BlockSpec((tk, tn), lambda i, j, kk: (kk, j)),
            pl.BlockSpec((1, tn), lambda i, j, kk: (0, j)),
        ],
        out_specs=pl.BlockSpec((tm, tn), lambda i, j, kk: (i, j)),
        scratch_shapes=[pltpu.VMEM((tm, tn), jnp.float32)],
        compiler_params=pltpu.CompilerParams(
            dimension_semantics=("parallel", "parallel", "arbitrary")),
    )(x, w, b.reshape(1, m))


# -----------------------------------------------------------------------------
# Plain LayerNorm (embeddings), row-tiled.
# -----------------------------------------------------------------------------
def _layernorm_kernel(x_ref, g_ref, b_ref, o_ref, *, eps):
    x = x_ref[...]
    mu = jnp.mean(x, axis=-1, keepdims=True)
    var = jnp.mean((x - mu) * (x - mu), axis=-1, keepdims=True)
    o_ref[...] = ((x - mu) * jax.lax.rsqrt(var + eps) * g_ref[...]
                  + b_ref[...]).astype(o_ref.dtype)


def layernorm(x, g, b, eps=1e-12):
    n, h = x.shape
    tm = _pick_tile(n, 512, 8)
    return pl.pallas_call(
        functools.partial(_layernorm_kernel, eps=eps),
        out_shape=jax.ShapeDtypeStruct((n, h), jnp.float32),
        grid=(n // tm,),
        in_specs=[pl.BlockSpec((tm, h), lambda i: (i, 0)),
                  pl.BlockSpec((1, h), lambda i: (0, 0)),
                  pl.BlockSpec((1, h), lambda i: (0, 0))],
        out_specs=pl.BlockSpec((tm, h), lambda i: (i, 0)),
        compiler_params=pltpu.CompilerParams(dimension_semantics=("parallel",)),
    )(x, g, b)


# -----------------------------------------------------------------------------
# Multi-head attention: one grid step per batch element, all heads inside.
# QKV arrives as a single lane-dense (S, 3H) bf16 slab; heads are static lane
# slices; output is a single lane-dense (S, H) bf16 store.
# -----------------------------------------------------------------------------
def _mha_kernel(qkv_ref, bias_ref, o_ref, *, num_heads, hidden, scale):
    qkv = qkv_ref[0]            # (S, 3H) bf16
    bias = bias_ref[0]          # (1, S) additive mask bias (f32)
    dh = hidden // num_heads
    ctx_heads = []
    for h in range(num_heads):
        q = qkv[:, h * dh:(h + 1) * dh]
        k = qkv[:, hidden + h * dh:hidden + (h + 1) * dh]
        v = qkv[:, 2 * hidden + h * dh:2 * hidden + (h + 1) * dh]
        s = jax.lax.dot_general(q, k, (((1,), (1,)), ((), ())),
                                preferred_element_type=jnp.float32)
        s = s * scale + bias
        s = s - jnp.max(s, axis=-1, keepdims=True)
        p = jnp.exp(s)
        p = p * pl.reciprocal(jnp.sum(p, axis=-1, keepdims=True), approx=True)
        ctx_heads.append(jnp.dot(p.astype(jnp.bfloat16), v,
                                 preferred_element_type=jnp.float32))
    o_ref[0] = jnp.concatenate(ctx_heads, axis=-1).astype(o_ref.dtype)


def attention(qkv, bias, num_heads, scale):
    # qkv: (B, S, 3H) bf16, bias: (B, 1, S) f32
    b, s, h3 = qkv.shape
    h = h3 // 3
    return pl.pallas_call(
        functools.partial(_mha_kernel, num_heads=num_heads, hidden=h, scale=scale),
        out_shape=jax.ShapeDtypeStruct((b, s, h), jnp.bfloat16),
        grid=(b,),
        in_specs=[pl.BlockSpec((1, s, h3), lambda i: (i, 0, 0)),
                  pl.BlockSpec((1, 1, s), lambda i: (i, 0, 0))],
        out_specs=pl.BlockSpec((1, s, h), lambda i: (i, 0, 0)),
        compiler_params=pltpu.CompilerParams(dimension_semantics=("parallel",)),
    )(qkv, bias)


# -----------------------------------------------------------------------------
# Fused: attention output projection + residual add + LayerNorm.
# -----------------------------------------------------------------------------
def _proj_add_ln_kernel(ctx_ref, w_ref, b_ref, res_ref, g_ref, beta_ref, o_ref,
                        *, eps):
    y = jnp.dot(ctx_ref[...].astype(jnp.bfloat16), w_ref[...].astype(jnp.bfloat16),
                preferred_element_type=jnp.float32)
    y = y + b_ref[...] + res_ref[...]
    mu = jnp.mean(y, axis=-1, keepdims=True)
    var = jnp.mean((y - mu) * (y - mu), axis=-1, keepdims=True)
    o_ref[...] = ((y - mu) * jax.lax.rsqrt(var + eps) * g_ref[...]
                  + beta_ref[...]).astype(o_ref.dtype)


def proj_add_layernorm(ctx, w, b, res, g, beta, eps=1e-12):
    n, k = ctx.shape
    _, m = w.shape
    tm = _pick_tile(n, 256, 8)
    return pl.pallas_call(
        functools.partial(_proj_add_ln_kernel, eps=eps),
        out_shape=jax.ShapeDtypeStruct((n, m), jnp.float32),
        grid=(n // tm,),
        in_specs=[pl.BlockSpec((tm, k), lambda i: (i, 0)),
                  pl.BlockSpec((k, m), lambda i: (0, 0)),
                  pl.BlockSpec((1, m), lambda i: (0, 0)),
                  pl.BlockSpec((tm, m), lambda i: (i, 0)),
                  pl.BlockSpec((1, m), lambda i: (0, 0)),
                  pl.BlockSpec((1, m), lambda i: (0, 0))],
        out_specs=pl.BlockSpec((tm, m), lambda i: (i, 0)),
        compiler_params=pltpu.CompilerParams(dimension_semantics=("parallel",)),
    )(ctx, w, b.reshape(1, m), res, g, beta)


# -----------------------------------------------------------------------------
# Fused FFN block: fc1 + GELU + fc2 + residual add + LayerNorm.
# -----------------------------------------------------------------------------
def _ffn_ln_kernel(x_ref, wi_ref, bi_ref, wf_ref, bf_ref, g_ref, beta_ref, o_ref,
                   *, eps):
    x = x_ref[...]
    h = jnp.dot(x.astype(jnp.bfloat16), wi_ref[...].astype(jnp.bfloat16),
                preferred_element_type=jnp.float32) + bi_ref[...]
    # TODO(synk): HF BERT uses exact erf-GELU; tanh approximation used here.
    h = jax.nn.gelu(h, approximate=True)
    y = jnp.dot(h.astype(jnp.bfloat16), wf_ref[...].astype(jnp.bfloat16),
                preferred_element_type=jnp.float32) + bf_ref[...] + x
    mu = jnp.mean(y, axis=-1, keepdims=True)
    var = jnp.mean((y - mu) * (y - mu), axis=-1, keepdims=True)
    o_ref[...] = ((y - mu) * jax.lax.rsqrt(var + eps) * g_ref[...]
                  + beta_ref[...]).astype(o_ref.dtype)


def ffn_add_layernorm(x, wi, bi, wf, bf, g, beta, eps=1e-12):
    n, hdim = x.shape
    _, inter = wi.shape
    tm = _pick_tile(n, 256, 8)
    return pl.pallas_call(
        functools.partial(_ffn_ln_kernel, eps=eps),
        out_shape=jax.ShapeDtypeStruct((n, hdim), jnp.float32),
        grid=(n // tm,),
        in_specs=[pl.BlockSpec((tm, hdim), lambda i: (i, 0)),
                  pl.BlockSpec((hdim, inter), lambda i: (0, 0)),
                  pl.BlockSpec((1, inter), lambda i: (0, 0)),
                  pl.BlockSpec((inter, hdim), lambda i: (0, 0)),
                  pl.BlockSpec((1, hdim), lambda i: (0, 0)),
                  pl.BlockSpec((1, hdim), lambda i: (0, 0)),
                  pl.BlockSpec((1, hdim), lambda i: (0, 0))],
        out_specs=pl.BlockSpec((tm, hdim), lambda i: (i, 0)),
        compiler_params=pltpu.CompilerParams(dimension_semantics=("parallel",)),
    )(x, wi, bi.reshape(1, inter), wf, bf.reshape(1, hdim), g, beta)


# -----------------------------------------------------------------------------
# Fused classification head:
#   section 'avg' pooling (batched (1,S)@(S,H) MXU reduce)
#   + section linear + concat + fc1 + sigmoid.
# concat([pooled, sec_out]) @ W1 == pooled @ W1[:H] + sec_out @ W1[H:]  (exact).
# -----------------------------------------------------------------------------
def _head_kernel(coef_ref, seq_ref, pooled_ref, ws_ref, bs_ref,
                 w1a_ref, w1b_ref, b1_ref, o_ref):
    # batched section pooling: (B,1,S) @ (B,S,H) -> (B,1,H) -> (B,H), f32
    sec = jax.lax.dot_general(
        coef_ref[...], seq_ref[...],
        dimension_numbers=(((2,), (1,)), ((0,), (0,))),
        preferred_element_type=jnp.float32)
    sec = sec.reshape(sec.shape[0], sec.shape[2])
    sec_out = jnp.dot(sec.astype(jnp.bfloat16), ws_ref[...],
                      preferred_element_type=jnp.float32) + bs_ref[...]
    y = (jnp.dot(pooled_ref[...].astype(jnp.bfloat16), w1a_ref[...],
                 preferred_element_type=jnp.float32)
         + jnp.dot(sec_out.astype(jnp.bfloat16), w1b_ref[...],
                   preferred_element_type=jnp.float32)
         + b1_ref[...])
    o_ref[...] = jax.nn.sigmoid(y).astype(o_ref.dtype)


def classification_head(coef, sec_seq, pooled, section_w, section_b, fc1_w, fc1_b):
    b, hdim = pooled.shape
    s = sec_seq.shape[1]
    num_labels = fc1_w.shape[1]
    w1a = fc1_w[:hdim]
    w1b = fc1_w[hdim:]
    return pl.pallas_call(
        _head_kernel,
        out_shape=jax.ShapeDtypeStruct((b, num_labels), jnp.float32),
        in_specs=[_vmem_spec()] * 8,
        out_specs=_vmem_spec(),
    )(coef.reshape(b, 1, s), sec_seq, pooled,
      section_w, section_b.reshape(1, -1),
      w1a, w1b, fc1_b.reshape(1, -1))


# -----------------------------------------------------------------------------
# token_lens_to_idxs : verbatim port of the PyTorch helper (pure Python).
# -----------------------------------------------------------------------------
def token_lens_to_idxs(token_lens):
    max_token_num = max([len(x) for x in token_lens])
    max_token_len = max([max(x) for x in token_lens])
    idxs, masks = ([], [])
    for seq_token_lens in token_lens:
        seq_idxs, seq_masks = ([], [])
        offset = 0
        for token_len in seq_token_lens:
            seq_idxs.extend([i + offset for i in range(token_len)] +
                            [-1] * (max_token_len - token_len))
            seq_masks.extend([1.0 / token_len] * token_len +
                             [0.0] * (max_token_len - token_len))
            offset += token_len
        seq_idxs.extend([-1] * max_token_len * (max_token_num - len(seq_token_lens)))
        seq_masks.extend([0.0] * max_token_len * (max_token_num - len(seq_token_lens)))
        idxs.append(seq_idxs)
        masks.append(seq_masks)
    return (idxs, masks, max_token_num, max_token_len)


def build_section_coef(token_lens, batch_size, seq_len):
    """Fold gather(idxs+1)*masks -> sum(token_len) -> mean(:section_num) into a
    single static per-position coefficient matrix coef[b, s]."""
    idxs, masks, token_num, token_len = token_lens_to_idxs(token_lens)
    idxs = np.asarray(idxs).reshape(batch_size, token_num, token_len) + 1
    masks = np.asarray(masks, dtype=np.float32).reshape(batch_size, token_num, token_len)
    section_num = [len(x) for x in token_lens]
    coef = np.zeros((batch_size, seq_len), dtype=np.float32)
    for b in range(batch_size):
        for t in range(section_num[b]):
            for j in range(token_len):
                coef[b, idxs[b, t, j]] += masks[b, t, j] / section_num[b]
    return jnp.asarray(coef)


# -----------------------------------------------------------------------------
# Synthetic BERT encoder (embeddings + transformer layers + pooler).
# Weights for matmuls are stored bf16 (halves HBM/VMEM traffic, native MXU
# dtype on v6e/v7x); LN params, biases and all elementwise math stay f32.
# -----------------------------------------------------------------------------
def init_bert_params(key, vocab_size, max_pos, hidden, num_heads, num_layers,
                     intermediate):
    keys = jax.random.split(key, 4 + num_layers)

    def dense(k, fan_in, fan_out):
        return (0.02 * jax.random.normal(k, (fan_in, fan_out))).astype(jnp.bfloat16)

    params = {
        "num_heads": num_heads,
        "word_emb": (0.02 * jax.random.normal(keys[0], (vocab_size, hidden))).astype(jnp.float32),
        "pos_emb": (0.02 * jax.random.normal(keys[1], (max_pos, hidden))).astype(jnp.float32),
        "type_emb": (0.02 * jax.random.normal(keys[2], (2, hidden))).astype(jnp.float32),
        "emb_ln_g": jnp.ones((1, hidden), jnp.float32),
        "emb_ln_b": jnp.zeros((1, hidden), jnp.float32),
        "layers": [],
    }
    pk = jax.random.split(keys[3], 1)[0]
    params["pool_w"] = dense(pk, hidden, hidden)
    params["pool_b"] = jnp.zeros((hidden,), jnp.float32)

    for l in range(num_layers):
        lk = jax.random.split(keys[4 + l], 6)
        wq = dense(lk[0], hidden, hidden)
        wk = dense(lk[1], hidden, hidden)
        wv = dense(lk[2], hidden, hidden)
        params["layers"].append({
            # fused QKV projection weight [H, 3H]
            "wqkv": jnp.concatenate([wq, wk, wv], axis=1),
            "bqkv": jnp.zeros((3 * hidden,), jnp.float32),
            "wo": dense(lk[3], hidden, hidden), "bo": jnp.zeros((hidden,), jnp.float32),
            "ln1_g": jnp.ones((1, hidden), jnp.float32), "ln1_b": jnp.zeros((1, hidden), jnp.float32),
            "wi": dense(lk[4], hidden, intermediate), "bi": jnp.zeros((intermediate,), jnp.float32),
            "wf": dense(lk[5], intermediate, hidden), "bf": jnp.zeros((hidden,), jnp.float32),
            "ln2_g": jnp.ones((1, hidden), jnp.float32), "ln2_b": jnp.zeros((1, hidden), jnp.float32),
        })
    return params


def bert_encoder(params, input_ids, attention_mask):
    """Returns (sequence_output [B,S,H], pooled_output [B,H]).
    Works on any (possibly combined) batch — batch elements are independent."""
    B, S = input_ids.shape
    H = params["word_emb"].shape[1]
    nH = params["num_heads"]
    Dh = H // nH

    # --- embeddings (glue: table lookups) + LayerNorm (kernel) ---
    we = jnp.take(params["word_emb"], input_ids, axis=0)
    pe = params["pos_emb"][None, :S, :]
    te = jnp.take(params["type_emb"], jnp.zeros_like(input_ids), axis=0)
    x = (we + pe + te).astype(jnp.float32)
    x = layernorm(x.reshape(B * S, H), params["emb_ln_g"], params["emb_ln_b"])
    # embedding dropout: identity in eval mode

    # additive attention-mask bias, one row per batch element: (B, 1, S)
    bias = ((1.0 - attention_mask.astype(jnp.float32)) * -10000.0).reshape(B, 1, S)
    scale = 1.0 / float(np.sqrt(Dh))

    for layer in params["layers"]:
        x2 = x                                                        # (B*S, H)
        # fused QKV projection: one matmul instead of three; bf16 slab out
        qkv = linear(x2, layer["wqkv"], layer["bqkv"],
                     out_dtype=jnp.bfloat16).reshape(B, S, 3 * H)
        # multi-head attention, all heads per batch element in one grid step
        ctx = attention(qkv, bias, nH, scale).reshape(B * S, H)
        # output projection + dropout(id) + residual + LayerNorm (fused)
        x2 = proj_add_layernorm(ctx, layer["wo"], layer["bo"], x2,
                                layer["ln1_g"], layer["ln1_b"])
        # fc1 + GELU + fc2 + dropout(id) + residual + LayerNorm (fused)
        x2 = ffn_add_layernorm(x2, layer["wi"], layer["bi"],
                               layer["wf"], layer["bf"],
                               layer["ln2_g"], layer["ln2_b"])
        x = x2

    seq = x.reshape(B, S, H)
    cls = seq[:, 0, :]                                                # (B, H)
    pooled = linear(cls, params["pool_w"], params["pool_b"], activation="tanh")
    return seq, pooled


# -----------------------------------------------------------------------------
# CONSORT-TM BERT module forward (target='[CLS]', section_emb=True, 'avg')
# -----------------------------------------------------------------------------
def bert_module_forward(bert_params, head_params,
                        text_ids, attention_mask_text,
                        section_ids, attention_mask_section,
                        sec_token_len):
    B, S = text_ids.shape

    # Run the two independent BERT passes (text + section) as ONE combined
    # batch: identical math, half the kernel dispatches, fuller tiles.
    ids = jnp.concatenate([text_ids, section_ids], axis=0)            # (2B, S)
    masks = jnp.concatenate([attention_mask_text, attention_mask_section], axis=0)
    seq, pooled = bert_encoder(bert_params, ids, masks)

    pooled_text = pooled[:B]                                          # output[1] of text pass
    sec_seq = seq[B:]                                                 # output[0] of section pass

    # 'avg' section pooling folded into a static coefficient matrix (MXU reduce
    # inside the head kernel), then section linear + concat + fc1 + sigmoid,
    # all fused. self.drop -> identity (eval).
    coef = build_section_coef(sec_token_len, B, S)
    return classification_head(coef, sec_seq, pooled_text,
                               head_params["section_w"], head_params["section_b"],
                               head_params["fc1_w"], head_params["fc1_b"])


# -----------------------------------------------------------------------------
if __name__ == "__main__":
    B, S, H = 2, 8, 32          # batch, seq_len, bert_dim
    nH, nL, I = 4, 2, 64        # heads, layers, intermediate
    VOCAB = 100
    SECTION_DIM = 16
    NUM_LABELS = 5

    key = jax.random.PRNGKey(0)
    k_params, k_head, k_text, k_sec = jax.random.split(key, 4)

    bert_params = init_bert_params(k_params, VOCAB, S, H, nH, nL, I)

    hk = jax.random.split(k_head, 2)
    head_params = {
        "section_w": (0.02 * jax.random.normal(hk[0], (H, SECTION_DIM))).astype(jnp.bfloat16),
        "section_b": jnp.zeros((SECTION_DIM,), jnp.float32),
        "fc1_w": (0.02 * jax.random.normal(hk[1], (H + SECTION_DIM, NUM_LABELS))).astype(jnp.bfloat16),
        "fc1_b": jnp.zeros((NUM_LABELS,), jnp.float32),
    }

    text_ids = jax.random.randint(k_text, (B, S), 0, VOCAB, dtype=jnp.int32)
    attention_mask_text = jnp.ones((B, S), jnp.float32).at[0, S - 2:].set(0.0)
    section_ids = jax.random.randint(k_sec, (B, S), 0, VOCAB, dtype=jnp.int32)
    attention_mask_section = jnp.ones((B, S), jnp.float32)
    sec_token_len = [[1, 3, 2], [2, 2, 1]]   # word-piece lengths per section

    out = bert_module_forward(bert_params, head_params,
                              text_ids, attention_mask_text,
                              section_ids, attention_mask_section,
                              sec_token_len)
    out = jax.block_until_ready(out)
    assert out.shape == (B, NUM_LABELS)
    assert bool(jnp.all(jnp.isfinite(out)))
    assert bool(jnp.all((out >= 0.0) & (out <= 1.0)))   # sigmoid output
    print("KERNEL_OK")
</pallas_src>

<mosaic_0001>
module attributes {stable_mosaic.version = 11 : i64} {
  func.func @_layernorm_kernel(%arg0: i32, %arg1: memref<32x32xf32, #tpu.memory_space<vmem>>, %arg2: memref<1x32xf32, #tpu.memory_space<vmem>>, %arg3: memref<1x32xf32, #tpu.memory_space<vmem>>, %arg4: memref<32x32xf32, #tpu.memory_space<vmem>>) attributes {dimension_semantics = [#tpu.dimension_semantics<parallel>], iteration_bounds = array<i64: 1>, scalar_prefetch = 0 : i64, scratch_operands = 0 : i64, tpu.core_type = #tpu.core_type<tc>, window_params = [{transform_indices = @transform_0, window_bounds = array<i64: 32, 32>}, {pipeline_mode = #tpu.pipeline_mode<synchronous>, transform_indices = @transform_1, window_bounds = array<i64: 1, 32>}, {pipeline_mode = #tpu.pipeline_mode<synchronous>, transform_indices = @transform_2, window_bounds = array<i64: 1, 32>}, {transform_indices = @transform_3, window_bounds = array<i64: 32, 32>}]} {
    %c0 = arith.constant 0 : index
    %c0_0 = arith.constant 0 : index
    %0 = vector.load %arg1[%c0, %c0_0] : memref<32x32xf32, #tpu.memory_space<vmem>>, vector<32x32xf32>
    %cst = arith.constant dense<0.000000e+00> : vector<32xf32>
    %1 = vector.multi_reduction <add>, %0, %cst [1] : vector<32x32xf32> to vector<32xf32>
    %2 = vector.shape_cast %1 : vector<32xf32> to vector<32x1xf32>
    %cst_1 = arith.constant 3.200000e+01 : f32
    %3 = vector.broadcast %cst_1 : f32 to vector<32x1xf32>
    %4 = arith.divf %2, %3 : vector<32x1xf32>
    %5 = vector.broadcast %4 : vector<32x1xf32> to vector<32x32xf32>
    %6 = arith.subf %0, %5 : vector<32x32xf32>
    %7 = vector.broadcast %4 : vector<32x1xf32> to vector<32x32xf32>
    %8 = arith.subf %0, %7 : vector<32x32xf32>
    %9 = arith.mulf %6, %8 : vector<32x32xf32>
    %cst_2 = arith.constant dense<0.000000e+00> : vector<32xf32>
    %10 = vector.multi_reduction <add>, %9, %cst_2 [1] : vector<32x32xf32> to vector<32xf32>
    %11 = vector.shape_cast %10 : vector<32xf32> to vector<32x1xf32>
    %cst_3 = arith.constant 3.200000e+01 : f32
    %12 = vector.broadcast %cst_3 : f32 to vector<32x1xf32>
    %13 = arith.divf %11, %12 : vector<32x1xf32>
    %14 = vector.broadcast %4 : vector<32x1xf32> to vector<32x32xf32>
    %15 = arith.subf %0, %14 : vector<32x32xf32>
    %cst_4 = arith.constant 9.99999996E-13 : f32
    %16 = vector.broadcast %cst_4 : f32 to vector<32x1xf32>
    %17 = arith.addf %13, %16 : vector<32x1xf32>
    %18 = math.rsqrt %17 : vector<32x1xf32>
    %19 = vector.broadcast %18 : vector<32x1xf32> to vector<32x32xf32>
    %20 = arith.mulf %15, %19 : vector<32x32xf32>
    %c0_5 = arith.constant 0 : index
    %c0_6 = arith.constant 0 : index
    %21 = vector.load %arg2[%c0_5, %c0_6] : memref<1x32xf32, #tpu.memory_space<vmem>>, vector<1x32xf32>
    %22 = vector.broadcast %21 : vector<1x32xf32> to vector<32x32xf32>
    %23 = arith.mulf %20, %22 : vector<32x32xf32>
    %c0_7 = arith.constant 0 : index
    %c0_8 = arith.constant 0 : index
    %24 = vector.load %arg3[%c0_7, %c0_8] : memref<1x32xf32, #tpu.memory_space<vmem>>, vector<1x32xf32>
    %25 = vector.broadcast %24 : vector<1x32xf32> to vector<32x32xf32>
    %26 = arith.addf %23, %25 : vector<32x32xf32>
    %c0_9 = arith.constant 0 : index
    %c0_10 = arith.constant 0 : index
    %27 = vector.load %arg4[%c0_9, %c0_10] : memref<32x32xf32, #tpu.memory_space<vmem>>, vector<32x32xf32>
    tpu.vector_store %arg4[%c0_9, %c0_10], %26 {strides = array<i32>} : memref<32x32xf32, #tpu.memory_space<vmem>>, vector<32x32xf32>,
    return
  }
  func.func @transform_0(%arg0: i32) -> (i32, i32) {
    %c0_i32 = arith.constant 0 : i32
    %c0_i32_0 = arith.constant 0 : i32
    return %arg0, %c0_i32 : i32, i32
  }
  func.func @transform_1(%arg0: i32) -> (i32, i32) {
    %c0_i32 = arith.constant 0 : i32
    %c0_i32_0 = arith.constant 0 : i32
    %c0_i32_1 = arith.constant 0 : i32
    return %c0_i32, %c0_i32_0 : i32, i32
  }
  func.func @transform_2(%arg0: i32) -> (i32, i32) {
    %c0_i32 = arith.constant 0 : i32
    %c0_i32_0 = arith.constant 0 : i32
    %c0_i32_1 = arith.constant 0 : i32
    return %c0_i32, %c0_i32_0 : i32, i32
  }
  func.func @transform_3(%arg0: i32) -> (i32, i32) {
    %c0_i32 = arith.constant 0 : i32
    %c0_i32_0 = arith.constant 0 : i32
    return %arg0, %c0_i32 : i32, i32
  }
}

</mosaic_0001>

<bundles_post_ra>
// kernel: tpu_custom_call.1
= control target key start
LH: loop header
LB: loop body
LE: loop exit
PB: predicated region body
PF: predicated region fallthrough
CT: control target
= control target key end

     0   :  { %8 = vsyncpa [#allocation3], 0  ;;  %s242_s0 = inlined_call_operand.hbm [shape: f32[32,32], index: 0, kind: input, shape index: {}]   ;;  %s243_s1 = inlined_call_operand.vmem [shape: f32[1,32], index: 1, kind: input, shape index: {}]   ;;  %s244_s2 = inlined_call_operand.vmem [shape: f32[1,32], index: 2, kind: input, shape index: {}]   ;;  %s245_s3 = inlined_call_operand.hbm [shape: f32[32,32], index: 3, kind: output, shape index: {}]  }
   0x1   :  { %9 = vsyncpa [#allocation4], 0  ;;  %s188_s12 = smov [#allocation2]  }
   0x2   :  { %s15_s13 = sshll.u32 %s188_s12, 4  ;;  %s16_s13 = int_to_ptr.vmem [resolvable:$true] %s15_s13 }
   0x3   :  { %s152_s14 = scalar_lea.vmem %s16_s13, 512  ;;  %p157_p1 = scmp.lt.s32.totalorder %s16_s13, %s16_s13 }
   0x4   :  { %p153_p0 = scmp.ne.s32.totalorder %s16_s13, %s152_s14  ;;  %p158_p2 = scmp.lt.s32.totalorder %s152_s14, %s152_s14 }
   0x6   :  { %p159_p3 = por %p158_p2, %p157_p1 }
   0x8   :  { %p160_p4 = pnand %p159_p3, %p153_p0 }
   0xa   :  { %163 = shalt.err (!%p160_p4)
}
   0xb   :  { %s189_s15 = smov 128   ;;  %s190_s16 = smov 8  }
   0xc   :  { %21 = dma.hbm_to_vmem [thread:$0]  %s242_s0, 512, %s16_s13, [#allocation3], %s189_s15, %s189_s15, %s190_s16  }
   0xd   :  { %184 = dma.done.wait [#allocation3], 512  }
   0xe   :  { %185 = vsyncadd [#allocation3], 4294966784  ;;  %vm33_vm0 = vcmask 261120   ;;  %v29_v0 = vld [vmem:[#allocation2] sm:$0xff]  ;;  %v31_v1 = vld [vmem:[#allocation2 + $0x10] sm:$0xff] }
   0xf   :  { %v30_v2 = vld [vmem:[#allocation2 + $0x8] sm:$0xff]  ;;  %v34_v3 = vsel %vm33_vm0, %v29_v0, 0.0  ;;  %v40_v4 = vsel %vm33_vm0, %v31_v1, 0.0  ;;  %v32_v5 = vld [vmem:[#allocation2 + $0x18] sm:$0xff]  ;;  %v130_v41 = vld [vmem:[%s243_s1] ss:$0 sm:$0xff] }
  0x10   :  { %35 = vadd.xlane.f32.xlu0 %v34_v3  ;;  %41 = vadd.xlane.f32.xlu1 %v40_v4  ;;  %v37_v6 = vsel %vm33_vm0, %v30_v2, 0.0  ;;  %v43_v7 = vsel %vm33_vm0, %v32_v5, 0.0  ;;  %v131_v43 = vld [vmem:[%s244_s2] ss:$0 sm:$0xff]  ;;  %s191_s1 = smov [#allocation5]  }
  0x11   :  { %s118_s22 = sshll.u32 %s191_s1, 4  ;;  %s119_s22 = int_to_ptr.vmem [resolvable:$true] %s118_s22 }
  0x12   :  { %s164_s2 = scalar_lea.vmem %s119_s22, 512  ;;  %p169_p6 = scmp.lt.s32.totalorder %s119_s22, %s119_s22 }
  0x13   :  { %p165_p5 = scmp.ne.s32.totalorder %s119_s22, %s164_s2  ;;  %p170_p7 = scmp.lt.s32.totalorder %s164_s2, %s164_s2 }
  0x14   :  { %38 = vadd.xlane.f32.xlu0 %v37_v6  ;;  %44 = vadd.xlane.f32.xlu1 %v43_v7 }
  0x15   :  { %p171_p8 = por %p170_p7, %p169_p6 }
  0x17   :  { %p172_p9 = pnand %p171_p8, %p165_p5 }
  0x99   :  { %v36_v8 = vpop.xlane.xlu0 %35  ;;  %v42_v9 = vpop.xlane.xlu1 %41 }
  0x9a   :  { %v47_v10 = vmul.f32 0.03125, %v36_v8  ;;  %v49_v11 = vmul.f32 0.03125, %v42_v9 }
  0x9c   :  { %v51_v12 = vsub.f32 %v29_v0, %v47_v10  ;;  %v53_v13 = vsub.f32 %v31_v1, %v49_v11 }
  0x9d   :  { %v39_v14 = vpop.xlane.xlu0 %38  ;;  %v45_v15 = vpop.xlane.xlu1 %44 }
  0x9e   :  { %v48_v16 = vmul.f32 0.03125, %v39_v14  ;;  %v50_v17 = vmul.f32 0.03125, %v45_v15  ;;  %v55_v18 = vmul.f32 %v51_v12, %v51_v12  ;;  %v57_v19 = vmul.f32 %v53_v13, %v53_v13 }
  0xa0   :  { %v52_v20 = vsub.f32 %v30_v2, %v48_v16  ;;  %v54_v21 = vsub.f32 %v32_v5, %v50_v17  ;;  %v59_v22 = vsel %vm33_vm0, %v55_v18, 0.0  ;;  %v65_v23 = vsel %vm33_vm0, %v57_v19, 0.0 }
  0xa1   :  { %60 = vadd.xlane.f32.xlu0 %v59_v22 }
  0xa2   :  { %v56_v24 = vmul.f32 %v52_v20, %v52_v20  ;;  %v58_v25 = vmul.f32 %v54_v21, %v54_v21 }
  0xa4   :  { %v62_v26 = vsel %vm33_vm0, %v56_v24, 0.0  ;;  %v68_v27 = vsel %vm33_vm0, %v58_v25, 0.0 }
  0xa5   :  { %66 = vadd.xlane.f32.xlu0 %v65_v23  ;;  %63 = vadd.xlane.f32.xlu1 %v62_v26 }
  0xa9   :  { %69 = vadd.xlane.f32.xlu1 %v68_v27 }
 0x12a   :  { %v61_v28 = vpop.xlane.xlu0 %60 }
 0x12b   :  { %v71_v29 = vmul.f32 0.03125, %v61_v28 }
 0x12d   :  { %v75_v30 = vadd.f32 1e-12, %v71_v29 }
 0x12e   :  { %v64_v31 = vpop.xlane.xlu1 %63  ;;  %v67_v32 = vpop.xlane.xlu0 %66 }
 0x12f   :  { %136 = vrsqrt.f32 %v75_v30  ;;  %v72_v33 = vmul.f32 0.03125, %v64_v31  ;;  %v73_v34 = vmul.f32 0.03125, %v67_v32 }
 0x131   :  { %v76_v35 = vadd.f32 1e-12, %v72_v33  ;;  %v77_v36 = vadd.f32 1e-12, %v73_v34 }
 0x132   :  { %v70_v37 = vpop.xlane.xlu1 %69 }
 0x133   :  { %138 = vrsqrt.f32 %v76_v35  ;;  %v74_v38 = vmul.f32 0.03125, %v70_v37 }
 0x134   :  { %140 = vrsqrt.f32 %v77_v36 }
 0x135   :  { %v78_v39 = vadd.f32 1e-12, %v74_v38 }
 0x137   :  { %142 = vrsqrt.f32 %v78_v39 }
 0x13c   :  { %v137_v40 = vpop.eup %136 }
 0x13d   :  { %v83_v42 = vmul.f32 %v137_v40, %v51_v12 }
 0x13f   :  { %v94_v44 = vmul.f32 %v130_v41, %v83_v42 }
 0x140   :  { %v139_v45 = vpop.eup %138 }
 0x141   :  { %v141_v46 = vpop.eup %140  ;;  %v84_v47 = vmul.f32 %v139_v45, %v52_v20  ;;  %v105_v48 = vadd.f32 %v131_v43, %v94_v44 }
 0x142   :  { %v85_v49 = vmul.f32 %v141_v46, %v53_v13 }
 0x143   :  { %v95_v50 = vmul.f32 %v130_v41, %v84_v47  ;;  %109 = vst.msk [vmem:[#allocation5] sm:$0xff] %vm33_vm0, %v105_v48 }
 0x144   :  { %v143_v51 = vpop.eup %142  ;;  %v96_v52 = vmul.f32 %v130_v41, %v85_v49 }
 0x145   :  { %v86_v53 = vmul.f32 %v143_v51, %v54_v21  ;;  %v106_v54 = vadd.f32 %v131_v43, %v95_v50 }
 0x146   :  { %v107_v55 = vadd.f32 %v131_v43, %v96_v52 }
 0x147   :  { %v97_v56 = vmul.f32 %v130_v41, %v86_v53  ;;  %110 = vst.msk [vmem:[#allocation5 + $0x8] sm:$0xff] %vm33_vm0, %v106_v54 }
 0x148   :  { %111 = vst.msk [vmem:[#allocation5 + $0x10] sm:$0xff] %vm33_vm0, %v107_v55 }
 0x149   :  { %v108_v57 = vadd.f32 %v131_v43, %v97_v56 }
 0x14b   :  { %112 = vst.msk [vmem:[#allocation5 + $0x18] sm:$0xff] %vm33_vm0, %v108_v57 }
 0x14c   :  { %175 = shalt.err (!%p172_p9)
}
 0x14d   :  { %124 = dma.vmem_to_hbm [thread:$0]  %s119_s22, 512, %s245_s3, [#allocation4], %s189_s15, %s189_s15, %s190_s16  }
 0x14e   :  { %186 = dma.done.wait [#allocation4], 512  }
 0x14f   :  { %187 = vsyncadd [#allocation4], 4294966784 }
 0x150   :  { %128 = vsyncpa [#allocation3], 1 }
 0x151   :  { %129 = vsyncpa [#allocation4], 1 }

</bundles_post_ra>
